<compile_context>
chip_gen: v6e
topology: v6e:2x2x1
jax: 0.10.0
libtpu: 0.0.40
codegen_flags: <defaults>
</compile_context>

<pallas_src>
import math

import jax
import jax.numpy as jnp
from jax.experimental import pallas as pl
from jax.experimental.pallas import tpu as pltpu

QUANTIZE_FACTOR = 1024 ** 2            # 2**20
SIGMOID_PIECEWISE_BOUND = 2
_VMEM_LIMIT_BYTES = 32 * 1024 * 1024   # within scoped budgets on v5e/v6e/v7x


def _round_up(x, m):
    return (x + m - 1) // m * m


def _pick_tile(total, step, max_tile):
    """Largest multiple of `step` that divides `total` and is <= max_tile."""
    t = min(total, max_tile)
    t -= t % step
    while t > step and total % t:
        t -= step
    return max(t, step)


def _cursed_sigmoid(x, quantize_factor=QUANTIZE_FACTOR):
    """Faithful port of cursed_sigmoid / near_zero_sigmoid_approx.

    middle = floor(QF/2) + trunc(x/4), zeroed strictly outside [-bound, bound]
    upper  = 0 for x < bound, QF for x > bound, x itself for x == bound
    (x * 0.25 is bit-exact vs x / 4: power-of-two scaling.)
    """
    qf = float(quantize_factor)
    bound = float(SIGMOID_PIECEWISE_BOUND * quantize_factor)
    upper = jnp.where(x < bound, 0.0, jnp.where(x > bound, qf, x))
    middle = float(math.floor(quantize_factor * 0.5)) + jnp.trunc(x * 0.25)
    middle = jnp.where((x < -bound) | (x > bound), 0.0, middle)
    return middle + upper


# ---------------------------------------------------------------------------
# Pass 1: streaming spatial-sum reduction (AdaptiveAvgPool2d numerator).
#   x2d block: (TR, TL); output block (TR, 1) stays resident across the lane
#   (reduction) grid axis -> accumulator pattern with pl.when init.
# ---------------------------------------------------------------------------
def _pool_sum_kernel(x_ref, sum_ref):
    @pl.when(pl.program_id(1) == 0)
    def _init():
        sum_ref[...] = jnp.zeros_like(sum_ref)

    sum_ref[...] += jnp.sum(x_ref[...], axis=-1, keepdims=True)


# ---------------------------------------------------------------------------
# Pass 2: streaming excitation apply.
#   scale_ref already contains cursed_sigmoid(scale) * (1/QF)  (per-row),
#   so the per-element work is one mul + trunc + add (minimal VPU op count).
# ---------------------------------------------------------------------------
def _apply_kernel(scale_ref, shift_ref, x_ref, o_ref):
    o_ref[...] = jnp.trunc(x_ref[...] * scale_ref[...]) + shift_ref[...]


@jax.jit
def squeeze_excitation(x_nchw, w1, b1, w2, b2):
    """Quantized SqueezeExcitation forward.

    x_nchw: (N, C, H, W) f32
    w1: (C//ratio, C), b1: (C//ratio,)   -- PyTorch nn.Linear layout (out, in)
    w2: (2*C, C//ratio), b2: (2*C,)
    """
    n, c, h, w = x_nchw.shape
    hw = h * w
    qf = float(QUANTIZE_FACTOR)

    c_pad = _round_up(c, 8)              # sublane-dense channels
    hw_pad = _round_up(hw, 128)          # lane-dense spatial axis
    r_rows = n * c_pad
    tl = _pick_tile(hw_pad, 128, 1024)   # lane tile (512-1024 amortizes step cost)
    tr = _pick_tile(r_rows, 8, 256)      # sublane tile; (256,1024) f32 block = 1 MiB

    # Layout plumbing: NCHW -> zero-padded (N*C_pad, HW_pad).
    x3 = x_nchw.reshape(n, c, hw)
    x3 = jnp.pad(x3, ((0, 0), (0, c_pad - c), (0, hw_pad - hw)))
    x2d = x3.reshape(r_rows, hw_pad)

    grid = (r_rows // tr, hw_pad // tl)

    # --- pass 1: per-(n,c) spatial sums (padding lanes are zero -> exact) ---
    sums = pl.pallas_call(
        _pool_sum_kernel,
        out_shape=jax.ShapeDtypeStruct((r_rows, 1), jnp.float32),
        grid=grid,
        in_specs=[pl.BlockSpec((tr, tl), lambda r, l: (r, l))],
        out_specs=pl.BlockSpec((tr, 1), lambda r, l: (r, 0)),
        compiler_params=pltpu.CompilerParams(
            dimension_semantics=("parallel", "arbitrary"),
            vmem_limit_bytes=_VMEM_LIMIT_BYTES),
    )(x2d)

    # --- squeeze math: O(N*C), once per batch, plain JAX (far below one MXU
    #     tile; keeps the Pallas grid shaped purely for HBM streaming) ---
    hi = jax.lax.Precision.HIGHEST
    pooled = jnp.trunc(sums.reshape(n, c_pad)[:, :c] / float(hw))          # (N, C)
    h1 = jnp.trunc((jnp.matmul(pooled, w1.T, precision=hi) + b1) / qf)
    h1 = jnp.maximum(h1, 0.0)                                              # ReLU
    h2 = jnp.trunc((jnp.matmul(h1, w2.T, precision=hi) + b2) / qf)         # (N, 2C)
    scale, shift = h2[:, :c], h2[:, c:]
    # Fold 1/QF into the per-channel scale (bit-exact: QF = 2^20).
    scale_mul = _cursed_sigmoid(scale) * (1.0 / qf)

    scale_col = jnp.pad(scale_mul, ((0, 0), (0, c_pad - c))).reshape(r_rows, 1)
    shift_col = jnp.pad(shift, ((0, 0), (0, c_pad - c))).reshape(r_rows, 1)

    # --- pass 2: streaming apply, lane-dense output tiles ---
    out2d = pl.pallas_call(
        _apply_kernel,
        out_shape=jax.ShapeDtypeStruct((r_rows, hw_pad), jnp.float32),
        grid=grid,
        in_specs=[pl.BlockSpec((tr, 1), lambda r, l: (r, 0)),
                  pl.BlockSpec((tr, 1), lambda r, l: (r, 0)),
                  pl.BlockSpec((tr, tl), lambda r, l: (r, l))],
        out_specs=pl.BlockSpec((tr, tl), lambda r, l: (r, l)),
        compiler_params=pltpu.CompilerParams(
            dimension_semantics=("parallel", "parallel"),
            vmem_limit_bytes=_VMEM_LIMIT_BYTES),
    )(scale_col, shift_col, x2d)

    out = out2d.reshape(n, c_pad, hw_pad)[:, :c, :hw]
    return out.reshape(n, c, h, w)


def _reference(x, w1, b1, w2, b2):
    """Pure-JAX mirror of SqueezeExcitation.forward (QUANTIZE_NETWORKS=True)."""
    n, c, h, w = x.shape
    qf = float(QUANTIZE_FACTOR)
    hi = jax.lax.Precision.HIGHEST
    pooled = jnp.trunc(jnp.sum(x, axis=(2, 3)) / float(h * w))   # AdaptiveAvgPool2d(1)+trunc
    h1 = jnp.maximum(
        jnp.trunc((jnp.matmul(pooled, w1.T, precision=hi) + b1) / qf), 0.0)
    h2 = jnp.trunc((jnp.matmul(h1, w2.T, precision=hi) + b2) / qf)
    scale = h2[:, :c].reshape(n, c, 1, 1)
    shift = h2[:, c:].reshape(n, c, 1, 1)
    return jnp.trunc(_cursed_sigmoid(scale) * x / qf) + shift


if __name__ == "__main__":
    # Small shapes consistent with the module: N=2, C=4, ratio=2, H=W=16.
    N, C, RATIO, H, W = 2, 4, 2, 16, 16
    CR = C // RATIO
    QF = float(QUANTIZE_FACTOR)

    key = jax.random.PRNGKey(0)
    kx, kw1, kb1, kw2, kb2 = jax.random.split(key, 5)

    # Synthetic quantized-regime data.  |x| is kept small enough that the
    # spatial sum stays below 2^24 (exact in f32 for any reduction order, so
    # tiled pooling matches the monolithic reference bit-for-bit), while the
    # lin2 outputs span the +-2*QF piecewise-sigmoid bounds.  All large
    # constants are Python floats (the previous version overflowed by passing
    # QUANTIZE_FACTOR**2 as a Python int to jnp).
    x = jnp.trunc(jax.random.uniform(kx, (N, C, H, W), jnp.float32,
                                     minval=-3.0e4, maxval=3.0e4))
    w1 = jnp.trunc(jax.random.uniform(kw1, (CR, C), jnp.float32,
                                      minval=-1.0, maxval=1.0) * QF)
    b1 = jnp.trunc(jax.random.uniform(kb1, (CR,), jnp.float32,
                                      minval=-1.0, maxval=1.0) * (1.0e3 * QF))
    w2 = jnp.trunc(jax.random.uniform(kw2, (2 * C, CR), jnp.float32,
                                      minval=-1.0, maxval=1.0) * (200.0 * QF))
    b2 = jnp.trunc(jax.random.uniform(kb2, (2 * C,), jnp.float32,
                                      minval=-1.0, maxval=1.0) * (QF * QF))

    out = jax.block_until_ready(squeeze_excitation(x, w1, b1, w2, b2))
    ref = jax.block_until_ready(_reference(x, w1, b1, w2, b2))

    assert out.shape == (N, C, H, W)
    assert out.dtype == jnp.float32
    # Quantized network: demand exact equality (no loose rtol masking +-1 steps).
    assert bool(jnp.array_equal(out, ref)), "mismatch vs reference"
    print("KERNEL_OK")
</pallas_src>

<mosaic_0001>
module attributes {stable_mosaic.version = 11 : i64} {
  func.func @_pool_sum_kernel(%arg0: i32, %arg1: i32, %arg2: memref<16x256xf32, #tpu.memory_space<vmem>>, %arg3: memref<16x1xf32, #tpu.memory_space<vmem>>) attributes {dimension_semantics = [#tpu.dimension_semantics<parallel>, #tpu.dimension_semantics<arbitrary>], iteration_bounds = array<i64: 1, 1>, scalar_prefetch = 0 : i64, scratch_operands = 0 : i64, tpu.core_type = #tpu.core_type<tc>, window_params = [{transform_indices = @transform_0, window_bounds = array<i64: 16, 256>}, {transform_indices = @transform_1, window_bounds = array<i64: 16, 1>}]} {
    %c0_i32 = arith.constant 0 : i32
    %0 = arith.cmpi eq, %arg1, %c0_i32 : i32
    %1 = arith.extui %0 : i1 to i32
    %c0_i32_0 = arith.constant 0 : i32
    %2 = arith.cmpi ne, %1, %c0_i32_0 : i32
    scf.if %2 {
      %cst_6 = arith.constant 0.000000e+00 : f32
      %9 = vector.broadcast %cst_6 : f32 to vector<16x1xf32>
      %c0_7 = arith.constant 0 : index
      %c0_8 = arith.constant 0 : index
      %10 = vector.load %arg3[%c0_7, %c0_8] : memref<16x1xf32, #tpu.memory_space<vmem>>, vector<16x1xf32>
      tpu.vector_store %arg3[%c0_7, %c0_8], %9 {strides = array<i32>} : memref<16x1xf32, #tpu.memory_space<vmem>>, vector<16x1xf32>,
    } else {
    }
    %c0 = arith.constant 0 : index
    %c0_1 = arith.constant 0 : index
    %3 = vector.load %arg3[%c0, %c0_1] : memref<16x1xf32, #tpu.memory_space<vmem>>, vector<16x1xf32>
    %c0_2 = arith.constant 0 : index
    %c0_3 = arith.constant 0 : index
    %4 = vector.load %arg2[%c0_2, %c0_3] : memref<16x256xf32, #tpu.memory_space<vmem>>, vector<16x256xf32>
    %cst = arith.constant dense<0.000000e+00> : vector<16xf32>
    %5 = vector.multi_reduction <add>, %4, %cst [1] : vector<16x256xf32> to vector<16xf32>
    %6 = vector.shape_cast %5 : vector<16xf32> to vector<16x1xf32>
    %7 = arith.addf %3, %6 : vector<16x1xf32>
    %c0_4 = arith.constant 0 : index
    %c0_5 = arith.constant 0 : index
    %8 = vector.load %arg3[%c0_4, %c0_5] : memref<16x1xf32, #tpu.memory_space<vmem>>, vector<16x1xf32>
    tpu.vector_store %arg3[%c0_4, %c0_5], %7 {strides = array<i32>} : memref<16x1xf32, #tpu.memory_space<vmem>>, vector<16x1xf32>,
    return
  }
  func.func @transform_0(%arg0: i32, %arg1: i32) -> (i32, i32) {
    %c0_i32 = arith.constant 0 : i32
    return %arg0, %arg1 : i32, i32
  }
  func.func @transform_1(%arg0: i32, %arg1: i32) -> (i32, i32) {
    %c0_i32 = arith.constant 0 : i32
    %c0_i32_0 = arith.constant 0 : i32
    return %arg0, %c0_i32 : i32, i32
  }
}

module attributes {stable_mosaic.version = 11 : i64} {
  func.func @_apply_kernel(%arg0: i32, %arg1: i32, %arg2: memref<16x1xf32, #tpu.memory_space<vmem>>, %arg3: memref<16x1xf32, #tpu.memory_space<vmem>>, %arg4: memref<16x256xf32, #tpu.memory_space<vmem>>, %arg5: memref<16x256xf32, #tpu.memory_space<vmem>>) attributes {dimension_semantics = [#tpu.dimension_semantics<parallel>, #tpu.dimension_semantics<parallel>], iteration_bounds = array<i64: 1, 1>, scalar_prefetch = 0 : i64, scratch_operands = 0 : i64, tpu.core_type = #tpu.core_type<tc>, window_params = [{transform_indices = @transform_0, window_bounds = array<i64: 16, 1>}, {transform_indices = @transform_1, window_bounds = array<i64: 16, 1>}, {transform_indices = @transform_2, window_bounds = array<i64: 16, 256>}, {transform_indices = @transform_3, window_bounds = array<i64: 16, 256>}]} {
    %c0 = arith.constant 0 : index
    %c0_0 = arith.constant 0 : index
    %0 = vector.load %arg4[%c0, %c0_0] : memref<16x256xf32, #tpu.memory_space<vmem>>, vector<16x256xf32>
    %c0_1 = arith.constant 0 : index
    %c0_2 = arith.constant 0 : index
    %1 = vector.load %arg2[%c0_1, %c0_2] : memref<16x1xf32, #tpu.memory_space<vmem>>, vector<16x1xf32>
    %2 = vector.broadcast %1 : vector<16x1xf32> to vector<16x256xf32>
    %3 = arith.mulf %0, %2 : vector<16x256xf32>
    %cst = arith.constant 0.000000e+00 : f32
    %4 = vector.broadcast %cst : f32 to vector<16x256xf32>
    %5 = arith.cmpf olt, %3, %4 : vector<16x256xf32>
    %6 = math.ceil %3 : vector<16x256xf32>
    %7 = math.floor %3 : vector<16x256xf32>
    %8 = arith.select %5, %6, %7 : vector<16x256xi1>, vector<16x256xf32>
    %c0_3 = arith.constant 0 : index
    %c0_4 = arith.constant 0 : index
    %9 = vector.load %arg3[%c0_3, %c0_4] : memref<16x1xf32, #tpu.memory_space<vmem>>, vector<16x1xf32>
    %10 = vector.broadcast %9 : vector<16x1xf32> to vector<16x256xf32>
    %11 = arith.addf %8, %10 : vector<16x256xf32>
    %c0_5 = arith.constant 0 : index
    %c0_6 = arith.constant 0 : index
    %12 = vector.load %arg5[%c0_5, %c0_6] : memref<16x256xf32, #tpu.memory_space<vmem>>, vector<16x256xf32>
    tpu.vector_store %arg5[%c0_5, %c0_6], %11 {strides = array<i32>} : memref<16x256xf32, #tpu.memory_space<vmem>>, vector<16x256xf32>,
    return
  }
  func.func @transform_0(%arg0: i32, %arg1: i32) -> (i32, i32) {
    %c0_i32 = arith.constant 0 : i32
    %c0_i32_0 = arith.constant 0 : i32
    return %arg0, %c0_i32 : i32, i32
  }
  func.func @transform_1(%arg0: i32, %arg1: i32) -> (i32, i32) {
    %c0_i32 = arith.constant 0 : i32
    %c0_i32_0 = arith.constant 0 : i32
    return %arg0, %c0_i32 : i32, i32
  }
  func.func @transform_2(%arg0: i32, %arg1: i32) -> (i32, i32) {
    %c0_i32 = arith.constant 0 : i32
    return %arg0, %arg1 : i32, i32
  }
  func.func @transform_3(%arg0: i32, %arg1: i32) -> (i32, i32) {
    %c0_i32 = arith.constant 0 : i32
    return %arg0, %arg1 : i32, i32
  }
}

</mosaic_0001>

<bundles_post_ra>
// kernel: squeeze_excitation.2
= control target key start
LH: loop header
LB: loop body
LE: loop exit
PB: predicated region body
PF: predicated region fallthrough
CT: control target
= control target key end

     0   :  { %vm12_vm0 = vcmask 7168   ;;  %v37_v3 = vmov 0.0   ;;  %s82_s0 = inlined_call_operand.vmem [shape: f32[16,256], index: 0, kind: input, shape index: {}]   ;;  %s83_s1 = inlined_call_operand.vmem [shape: f32[16,1], index: 1, kind: output, shape index: {}]  }
   0x1   :  { %v17_v0 = vld [vmem:[%s82_s0] sm:$0xff]  ;;  %v18_v1 = vld [vmem:[%s82_s0 + $0x8] sm:$0xff]  ;;  %v19_v2 = vld [vmem:[%s82_s0 + $0x10] sm:$0xff]  ;;  %13 = vst.msk [vmem:[%s83_s1] sm:$0xff] %vm12_vm0, %v37_v3 }
   0x2   :  { %14 = vst.msk [vmem:[%s83_s1 + $0x8] sm:$0xff] %vm12_vm0, %v37_v3  ;;  %v21_v4 = vadd.f32 %v18_v1, %v17_v0  ;;  %v20_v5 = vld [vmem:[%s82_s0 + $0x18] sm:$0xff] }
   0x3   :  { %v24_v6 = vadd.f32 %v20_v5, %v19_v2 }
   0x4   :  { %22 = vadd.xlane.f32.xlu0 %v21_v4 }
   0x8   :  { %25 = vadd.xlane.f32.xlu0 %v24_v6  ;;  %v15_v7 = vld [vmem:[%s83_s1] sm:$0xff] }
   0x9   :  { %v16_v10 = vld [vmem:[%s83_s1 + $0x8] sm:$0xff] }
  0x8d   :  { %v23_v8 = vpop.xlane.xlu0 %22 }
  0x8e   :  { %v27_v9 = vadd.f32 %v23_v8, %v15_v7 }
  0x90   :  { %30 = vst.msk [vmem:[%s83_s1] sm:$0xff] %vm12_vm0, %v27_v9 }
  0x91   :  { %v26_v11 = vpop.xlane.xlu0 %25 }
  0x92   :  { %v28_v12 = vadd.f32 %v26_v11, %v16_v10 }
  0x94   :  { %31 = vst.msk [vmem:[%s83_s1 + $0x8] sm:$0xff] %vm12_vm0, %v28_v12 }

// kernel: squeeze_excitation.3
= control target key start
LH: loop header
LB: loop body
LE: loop exit
PB: predicated region body
PF: predicated region fallthrough
CT: control target
= control target key end

     0   :  { %v77_v0 = vmov 0   ;;  %s134_s0 = inlined_call_operand.vmem [shape: f32[16,1], index: 0, kind: input, shape index: {}]   ;;  %s135_s1 = inlined_call_operand.vmem [shape: f32[16,1], index: 1, kind: input, shape index: {}]   ;;  %s136_s2 = inlined_call_operand.vmem [shape: f32[16,256], index: 2, kind: input, shape index: {}]   ;;  %s137_s3 = inlined_call_operand.vmem [shape: f32[16,256], index: 3, kind: output, shape index: {}]  }
   0x1   :  { %75 = vset.pattern.permute.xlu0 %v77_v0  ;;  %76 = vset.pattern.permute.xlu1 %v77_v0  ;;  %v18_v1 = vld [vmem:[%s134_s0] sm:$0xff]  ;;  %v19_v3 = vld [vmem:[%s134_s0 + $0x8] sm:$0xff]  ;;  %v16_v10 = vld [vmem:[%s136_s2 + $0x10] sm:$0xff] }
   0x2   :  { %v50_v2 = vld [vmem:[%s135_s1] sm:$0xff]  ;;  %22 = vperm.xlu0 %75, %v18_v1   ;;  %v51_v4 = vld [vmem:[%s135_s1 + $0x8] sm:$0xff]  ;;  %v17_v11 = vld [vmem:[%s136_s2 + $0x18] sm:$0xff] }
   0x3   :  { %54 = vperm.xlu1 %76, %v50_v2   ;;  %v14_v5 = vld [vmem:[%s136_s2] sm:$0xff]  ;;  %v15_v6 = vld [vmem:[%s136_s2 + $0x8] sm:$0xff] }
   0x6   :  { %27 = vperm.xlu0 %75, %v19_v3  }
   0x7   :  { %59 = vperm.xlu1 %76, %v51_v4  }
  0x7d   :  { %v23_v7 = vpop.permute.xlu0 %22 }
  0x7e   :  { %v30_v8 = vmul.f32 %v23_v7, %v14_v5  ;;  %v31_v9 = vmul.f32 %v23_v7, %v15_v6  ;;  %v55_v16 = vpop.permute.xlu1 %54 }
  0x80   :  { %v38_v12 = vceil.f32 %v30_v8  ;;  %v39_v13 = vceil.f32 %v31_v9  ;;  %v42_v14 = vfloor.f32 %v30_v8  ;;  %v43_v15 = vfloor.f32 %v31_v9 }
  0x81   :  { %vm34_vm0 = vcmp.lt.f32.partialorder %v30_v8, 0.0  ;;  %vm35_vm1 = vcmp.lt.f32.partialorder %v31_v9, 0.0  ;;  %v28_v17 = vpop.permute.xlu0 %27 }
  0x82   :  { %v46_v18 = vsel %vm34_vm0, %v38_v12, %v42_v14  ;;  %v47_v19 = vsel %vm35_vm1, %v39_v13, %v43_v15  ;;  %v32_v20 = vmul.f32 %v28_v17, %v16_v10  ;;  %v33_v21 = vmul.f32 %v28_v17, %v17_v11  ;;  %v60_v28 = vpop.permute.xlu1 %59 }
  0x83   :  { %v62_v22 = vadd.f32 %v55_v16, %v46_v18  ;;  %v63_v23 = vadd.f32 %v55_v16, %v47_v19 }
  0x84   :  { %v40_v24 = vceil.f32 %v32_v20  ;;  %v41_v25 = vceil.f32 %v33_v21  ;;  %v44_v26 = vfloor.f32 %v32_v20  ;;  %v45_v27 = vfloor.f32 %v33_v21 }
  0x85   :  { %66 = vst [vmem:[%s137_s3] sm:$0xff] %v62_v22  ;;  %67 = vst [vmem:[%s137_s3 + $0x8] sm:$0xff] %v63_v23  ;;  %vm36_vm2 = vcmp.lt.f32.partialorder %v32_v20, 0.0  ;;  %vm37_vm3 = vcmp.lt.f32.partialorder %v33_v21, 0.0 }
  0x86   :  { %v48_v29 = vsel %vm36_vm2, %v40_v24, %v44_v26  ;;  %v49_v30 = vsel %vm37_vm3, %v41_v25, %v45_v27 }
  0x87   :  { %v64_v31 = vadd.f32 %v60_v28, %v48_v29  ;;  %v65_v32 = vadd.f32 %v60_v28, %v49_v30 }
  0x89   :  { %68 = vst [vmem:[%s137_s3 + $0x10] sm:$0xff] %v64_v31  ;;  %69 = vst [vmem:[%s137_s3 + $0x18] sm:$0xff] %v65_v32 }

</bundles_post_ra>
